<compile_context>
chip_gen: v5e
topology: v5e:2x2
jax: 0.10.0
libtpu: 0.0.40
codegen_flags: <defaults>
</compile_context>

<pallas_src>
import functools

import jax
import jax.numpy as jnp
from jax import lax
from jax.experimental import pallas as pl
from jax.experimental.pallas import tpu as pltpu


# ---------------------------------------------------------------------------
# Hardware introspection (best effort, safe fallbacks).
# ---------------------------------------------------------------------------
@functools.lru_cache(maxsize=1)
def _tpu_info():
    try:
        return pltpu.get_tpu_info()
    except Exception:
        return None


def _vmem_capacity_bytes() -> int:
    info = _tpu_info()
    if info is not None:
        for attr in ("vmem_capacity_bytes", "vmem_bytes", "vmem_size_bytes"):
            v = getattr(info, attr, None)
            if v:
                try:
                    return int(v)
                except Exception:
                    pass
    return 64 << 20  # conservative: v7x per-TensorCore VMEM


def _supports_native_bf16_alu() -> bool:
    """True on chips with a bf16 VPU (v6e / v7x); False -> compute in f32."""
    info = _tpu_info()
    name = ""
    if info is not None:
        for attr in ("chip_version", "version", "chip_name", "name"):
            v = getattr(info, attr, None)
            if v is not None:
                name = str(v).lower()
                break
    if not name:
        return False  # unknown -> f32 compute is safe everywhere
    for tag in ("v2", "v3", "v4", "v5"):
        if tag in name:
            return False
    return True


# ---------------------------------------------------------------------------
# Kernel
# ---------------------------------------------------------------------------
def _bubble(tops, v):
    """Insert row-chunk v into the descending register list (pure VPU max/min)."""
    out = []
    for t in tops:
        hi = jnp.maximum(t, v)
        v = jnp.minimum(t, v)
        out.append(hi)
    return tuple(out)


def _store_result(o_ref, tops, tot, *, k, complement):
    Bt, Ht = o_ref.shape
    top_sum = jnp.zeros((Bt, 1, Ht), jnp.float32)
    for t in tops:
        top_sum = top_sum + t.astype(jnp.float32)
    if complement:
        # top-k sum = sum(x) - sum of (S-k) smallest = total + sum(top of -x)
        total = tot if tot.shape[1] == 1 else jnp.sum(tot, axis=1, keepdims=True)
        res = (total + top_sum) * (1.0 / k)
    else:
        res = top_sum * (1.0 / k)
    o_ref[...] = res[:, 0, :].astype(o_ref.dtype)


def _topk_mean_kernel(x_ref, o_ref, *scratch, k, n_sel, complement,
                      streaming, p, S, s_blk, cdt):
    Bt, _, Ht = x_ref.shape
    neg_inf = jnp.asarray(-jnp.inf, dtype=cdt)

    si = 0
    regs_ref = None
    tot_ref = None
    if streaming and n_sel > 0:
        regs_ref = scratch[si]; si += 1
    if streaming and complement:
        tot_ref = scratch[si]; si += 1

    store = functools.partial(_store_result, o_ref, k=k, complement=complement)

    # ----------------- direct mode: the whole sequence is in this block ------
    if not streaming:
        tops = tuple(jnp.full((Bt, 1, Ht), -jnp.inf, cdt) for _ in range(n_sel))
        tot = jnp.zeros((Bt, 1, Ht), jnp.float32) if complement else None

        def eat_row(v, tops, tot):
            v = v.astype(cdt)
            if complement:
                tot = tot + v.astype(jnp.float32)
                v = -v
            if n_sel > 0:
                tops = _bubble(tops, v)
            return tops, tot

        if S * max(n_sel, 1) <= 512:
            for r in range(S):
                tops, tot = eat_row(x_ref[:, r:r + 1, :], tops, tot)
        else:
            def row_body(r, carry):
                tops, tot = carry
                return eat_row(x_ref[:, pl.ds(r, 1), :], tops, tot)
            tops, tot = lax.fori_loop(0, S, row_body, (tops, tot))

        store(tops, tot)
        return

    # ----------------- streaming mode: S chunked through the grid ------------
    s = pl.program_id(2)
    n_s = pl.num_programs(2)

    @pl.when(s == 0)
    def _init():
        if regs_ref is not None:
            regs_ref[...] = jnp.full(regs_ref.shape, -jnp.inf, regs_ref.dtype)
        if tot_ref is not None:
            tot_ref[...] = jnp.zeros(tot_ref.shape, tot_ref.dtype)

    regs = tuple(regs_ref[i] for i in range(n_sel)) if regs_ref is not None else ()
    tot = tot_ref[...] if tot_ref is not None else None

    n_full = s_blk // p
    rem = s_blk % p                     # in-block tail (only when s_blk == S)
    need_gmask = (S % s_blk) != 0       # last grid step along S is partial

    def consume(off, regs, tot, keep=None):
        v = x_ref[:, pl.ds(off, p), :].astype(cdt)
        if need_gmask:
            rows = s * s_blk + off + lax.broadcasted_iota(jnp.int32, (Bt, p, Ht), 1)
            m = rows < S
            keep = m if keep is None else jnp.logical_and(keep, m)
        if complement:
            vt = v.astype(jnp.float32)
            if keep is not None:
                vt = jnp.where(keep, vt, 0.0)
            tot = tot + vt
            v = -v
        if keep is not None:
            v = jnp.where(keep, v, neg_inf)
        if n_sel > 0:
            regs = _bubble(regs, v)
        return regs, tot

    if n_full > 0:
        def chunk_body(ci, carry):
            regs, tot = carry
            off = pl.multiple_of(ci * p, p)
            return consume(off, regs, tot)

        unroll = True if n_full <= 4 else 4
        regs, tot = lax.fori_loop(0, n_full, chunk_body, (regs, tot), unroll=unroll)

    if rem > 0:
        # Last p rows of the block; drop rows already covered by the main chunks.
        keep = lax.broadcasted_iota(jnp.int32, (Bt, p, Ht), 1) >= (p - rem)
        regs, tot = consume(s_blk - p, regs, tot, keep=keep)

    # Persist carried state for the next sequence step.
    if regs_ref is not None:
        for i in range(n_sel):
            regs_ref[i] = regs[i]
    if tot_ref is not None:
        tot_ref[...] = tot

    @pl.when(s == n_s - 1)
    def _finalize():
        tops = tuple(jnp.full((Bt, 1, Ht), -jnp.inf, cdt) for _ in range(n_sel))
        if n_sel > 0:
            C = n_sel * p
            if C * n_sel <= 512:
                merged = tops
                for reg in regs:
                    for j in range(p):
                        merged = _bubble(merged, reg[:, j:j + 1, :])
                tops = merged
            else:
                cand = jnp.concatenate(list(regs), axis=1)      # (Bt, C, Ht)

                def merge_body(j, tops):
                    v = lax.dynamic_slice_in_dim(cand, j, 1, axis=1)
                    return _bubble(tops, v)

                tops = lax.fori_loop(0, C, merge_body, tops,
                                     unroll=True if C <= 64 else 8)
        store(tops, tot)


# ---------------------------------------------------------------------------
# Wrapper
# ---------------------------------------------------------------------------
def _pick_tiles(B, H):
    """(Bt, Ht): layout-legal (mult-of-8 / full-dim batch, lane-dense hidden)."""
    if B % 8 == 0:
        Bt = 8
        for c in (32, 16, 8):
            if B % c == 0:
                Bt = c
                break
    else:
        Bt = B
    if H % 128 == 0:
        choices = [c for c in (512, 256, 128) if H % c == 0]
        Ht = choices[0]
        if B // Bt < 2:                 # keep >=2 parallel steps for v7x's 2 TCs
            for c in choices:
                if H // c >= 2:
                    Ht = c
                    break
    else:
        Ht = H
    return Bt, Ht


def topk_pooling(x: jax.Array, k: int, dim: int = 1,
                 max_block_rows=None) -> jax.Array:
    """Mean of the top-k values of x along dim=1. x: [B, S, H] -> [B, H]."""
    assert dim == 1, "kernel implemented for pooling over the sequence axis (dim=1)"
    B, S, H = x.shape
    k = int(k)
    assert 1 <= k <= S

    # Work on the smaller side: remove the S-k smallest when k > S/2.
    complement = k > S - k
    n_sel = (S - k) if complement else k

    itemsize = jnp.dtype(x.dtype).itemsize
    use_bf16 = (x.dtype == jnp.bfloat16) and _supports_native_bf16_alu()
    cdt = jnp.bfloat16 if use_bf16 else jnp.float32
    cdt_item = jnp.dtype(cdt).itemsize
    p = 16 if use_bf16 else 8               # rows per streamed chunk (full vreg)

    vmem_cap = _vmem_capacity_bytes()
    big_vmem = vmem_cap >= (96 << 20)       # 128 MiB chips (v5e/v6e) vs v7x (64 MiB)
    step_budget = (48 << 20) if big_vmem else (16 << 20)   # 2x-buffered input tile
    limit_cap = max(min(vmem_cap - (16 << 20), 100 << 20), 24 << 20)

    Bt, Ht = _pick_tiles(B, H)

    # Streaming (S chunked through the grid with carried registers) vs direct.
    streaming = S >= 2 * p
    if streaming and n_sel > 0:
        reg_cap = 128 << 10                 # keep carried registers in vregs

        def reg_bytes(bt, ht):
            return n_sel * bt * p * ht * cdt_item

        if reg_bytes(Bt, Ht) > reg_cap and Ht > 128 and H % 128 == 0:
            Ht = 128                        # prefer streaming over a wider Ht
        if reg_bytes(Bt, Ht) > reg_cap and Bt > 8 and B % 8 == 0:
            Bt = 8
        if reg_bytes(Bt, Ht) > reg_cap:
            # TODO(synk): very large n_sel (k near S/2 with long S) falls back to a
            # slow full-S scan; a sort/heap-based kernel would be needed there.
            streaming = False

    if not streaming and S > 2 * p:
        # Full-S block fallback: keep the tile as small as layout rules allow.
        if H % 128 == 0:
            Ht = 128
        if B % 8 == 0:
            Bt = 8

    # Sequence blocking (grid axis, "arbitrary", last).
    if streaming:
        rows_cap = max(p, (step_budget // (2 * Bt * Ht * itemsize)) // p * p)
        if max_block_rows is not None:
            rows_cap = min(rows_cap, max(p, (int(max_block_rows) // p) * p))
        rows_cap = min(rows_cap, 4096)
        s_blk = S if rows_cap >= S else rows_cap
        n_s = pl.cdiv(S, s_blk)
    else:
        s_blk = S
        n_s = 1

    # Scratch persists across the sequence steps of the grid.
    scratch = []
    scratch_bytes = 0
    if streaming and n_sel > 0:
        scratch.append(pltpu.VMEM((n_sel, Bt, p, Ht), cdt))
        scratch_bytes += n_sel * Bt * p * Ht * cdt_item
    if streaming and complement:
        scratch.append(pltpu.VMEM((Bt, p, Ht), jnp.float32))
        scratch_bytes += Bt * p * Ht * 4

    est_vmem = (2 * Bt * s_blk * Ht * itemsize + scratch_bytes
                + 2 * Bt * Ht * itemsize + (2 << 20))
    cp = dict(dimension_semantics=("parallel", "parallel", "arbitrary"))
    if est_vmem > (12 << 20):
        cp["vmem_limit_bytes"] = int(min(est_vmem + (8 << 20), limit_cap))

    cost = pl.CostEstimate(
        flops=int(2 * max(n_sel, 1) * B * S * H),
        transcendentals=0,
        bytes_accessed=int(B * S * H * itemsize + B * H * itemsize),
    )

    kernel = functools.partial(
        _topk_mean_kernel, k=k, n_sel=n_sel, complement=complement,
        streaming=streaming, p=p, S=S, s_blk=s_blk, cdt=cdt)

    return pl.pallas_call(
        kernel,
        out_shape=jax.ShapeDtypeStruct((B, H), x.dtype),
        grid_spec=pltpu.PrefetchScalarGridSpec(
            num_scalar_prefetch=0,
            grid=(B // Bt, H // Ht, n_s),
            in_specs=[pl.BlockSpec((Bt, s_blk, Ht), lambda b, h, s: (b, s, h))],
            out_specs=pl.BlockSpec((Bt, Ht), lambda b, h, s: (b, h)),
            scratch_shapes=scratch,
        ),
        compiler_params=pltpu.CompilerParams(**cp),
        cost_estimate=cost,
    )(x)


def _reference(x: jax.Array, k: int, dim: int = 1) -> jax.Array:
    # pure-JAX reference mirroring torch.topk(...).values.mean(dim)
    vals = lax.top_k(jnp.moveaxis(x, dim, -1), k)[0]
    return vals.mean(axis=-1).astype(x.dtype)


if __name__ == "__main__":
    key = jax.random.PRNGKey(0)

    # (B, S, H, k, max_block_rows)
    configs = [
        (2, 8, 32, 4, None),      # module-sized case, direct mode
        (2, 256, 384, 5, None),   # streaming, lane-tiled H (Ht=128)
        (2, 100, 128, 3, None),   # streaming, unaligned in-block tail
        (2, 16, 32, 12, None),    # complement path (k > S/2)
        (2, 300, 128, 9, 128),    # multi-step sequence grid + partial last block
        (16, 64, 128, 3, None),   # multi-batch tiles (Bt chosen as multiple of 8)
    ]
    for i, (B, S, H, k, mbr) in enumerate(configs):
        key, sub = jax.random.split(key)
        x = jax.random.normal(sub, (B, S, H), dtype=jnp.float32)
        out = topk_pooling(x, k=k, dim=1, max_block_rows=mbr)
        jax.block_until_ready(out)
        ref = _reference(x, k, 1)
        assert out.shape == (B, H), f"shape mismatch in config {i}"
        assert jnp.allclose(out, ref, atol=1e-5, rtol=1e-5), f"mismatch in config {i}"
    print("KERNEL_OK")
</pallas_src>

<mosaic_0001>
module attributes {stable_mosaic.version = 11 : i64} {
  func.func @_topk_mean_kernel(%arg0: i32, %arg1: i32, %arg2: i32, %arg3: memref<2x8x32xf32, #tpu.memory_space<vmem>>, %arg4: memref<2x32xf32, #tpu.memory_space<vmem>>) attributes {dimension_semantics = [#tpu.dimension_semantics<parallel>, #tpu.dimension_semantics<parallel>, #tpu.dimension_semantics<arbitrary>], iteration_bounds = array<i64: 1, 1, 1>, scalar_prefetch = 0 : i64, scratch_operands = 0 : i64, tpu.core_type = #tpu.core_type<tc>, window_params = [{transform_indices = @transform_0, window_bounds = array<i64: 2, 8, 32>}, {transform_indices = @transform_1, window_bounds = array<i64: 2, 32>}]} {
    %cst = arith.constant 0xFF800000 : f32
    %0 = vector.broadcast %cst : f32 to vector<2x1x32xf32>
    %cst_0 = arith.constant 0xFF800000 : f32
    %1 = vector.broadcast %cst_0 : f32 to vector<2x1x32xf32>
    %cst_1 = arith.constant 0xFF800000 : f32
    %2 = vector.broadcast %cst_1 : f32 to vector<2x1x32xf32>
    %cst_2 = arith.constant 0xFF800000 : f32
    %3 = vector.broadcast %cst_2 : f32 to vector<2x1x32xf32>
    %c0 = arith.constant 0 : index
    %c0_3 = arith.constant 0 : index
    %c0_4 = arith.constant 0 : index
    %4 = vector.load %arg3[%c0, %c0_3, %c0_4] : memref<2x8x32xf32, #tpu.memory_space<vmem>>, vector<2x1x32xf32>
    %5 = arith.maximumf %0, %4 : vector<2x1x32xf32>
    %6 = arith.minimumf %0, %4 : vector<2x1x32xf32>
    %7 = arith.maximumf %1, %6 : vector<2x1x32xf32>
    %8 = arith.minimumf %1, %6 : vector<2x1x32xf32>
    %9 = arith.maximumf %2, %8 : vector<2x1x32xf32>
    %10 = arith.minimumf %2, %8 : vector<2x1x32xf32>
    %11 = arith.maximumf %3, %10 : vector<2x1x32xf32>
    %c0_5 = arith.constant 0 : index
    %c1 = arith.constant 1 : index
    %c0_6 = arith.constant 0 : index
    %12 = vector.load %arg3[%c0_5, %c1, %c0_6] : memref<2x8x32xf32, #tpu.memory_space<vmem>>, vector<2x1x32xf32>
    %13 = arith.maximumf %5, %12 : vector<2x1x32xf32>
    %14 = arith.minimumf %5, %12 : vector<2x1x32xf32>
    %15 = arith.maximumf %7, %14 : vector<2x1x32xf32>
    %16 = arith.minimumf %7, %14 : vector<2x1x32xf32>
    %17 = arith.maximumf %9, %16 : vector<2x1x32xf32>
    %18 = arith.minimumf %9, %16 : vector<2x1x32xf32>
    %19 = arith.maximumf %11, %18 : vector<2x1x32xf32>
    %c0_7 = arith.constant 0 : index
    %c2 = arith.constant 2 : index
    %c0_8 = arith.constant 0 : index
    %20 = vector.load %arg3[%c0_7, %c2, %c0_8] : memref<2x8x32xf32, #tpu.memory_space<vmem>>, vector<2x1x32xf32>
    %21 = arith.maximumf %13, %20 : vector<2x1x32xf32>
    %22 = arith.minimumf %13, %20 : vector<2x1x32xf32>
    %23 = arith.maximumf %15, %22 : vector<2x1x32xf32>
    %24 = arith.minimumf %15, %22 : vector<2x1x32xf32>
    %25 = arith.maximumf %17, %24 : vector<2x1x32xf32>
    %26 = arith.minimumf %17, %24 : vector<2x1x32xf32>
    %27 = arith.maximumf %19, %26 : vector<2x1x32xf32>
    %c0_9 = arith.constant 0 : index
    %c3 = arith.constant 3 : index
    %c0_10 = arith.constant 0 : index
    %28 = vector.load %arg3[%c0_9, %c3, %c0_10] : memref<2x8x32xf32, #tpu.memory_space<vmem>>, vector<2x1x32xf32>
    %29 = arith.maximumf %21, %28 : vector<2x1x32xf32>
    %30 = arith.minimumf %21, %28 : vector<2x1x32xf32>
    %31 = arith.maximumf %23, %30 : vector<2x1x32xf32>
    %32 = arith.minimumf %23, %30 : vector<2x1x32xf32>
    %33 = arith.maximumf %25, %32 : vector<2x1x32xf32>
    %34 = arith.minimumf %25, %32 : vector<2x1x32xf32>
    %35 = arith.maximumf %27, %34 : vector<2x1x32xf32>
    %c0_11 = arith.constant 0 : index
    %c4 = arith.constant 4 : index
    %c0_12 = arith.constant 0 : index
    %36 = vector.load %arg3[%c0_11, %c4, %c0_12] : memref<2x8x32xf32, #tpu.memory_space<vmem>>, vector<2x1x32xf32>
    %37 = arith.maximumf %29, %36 : vector<2x1x32xf32>
    %38 = arith.minimumf %29, %36 : vector<2x1x32xf32>
    %39 = arith.maximumf %31, %38 : vector<2x1x32xf32>
    %40 = arith.minimumf %31, %38 : vector<2x1x32xf32>
    %41 = arith.maximumf %33, %40 : vector<2x1x32xf32>
    %42 = arith.minimumf %33, %40 : vector<2x1x32xf32>
    %43 = arith.maximumf %35, %42 : vector<2x1x32xf32>
    %c0_13 = arith.constant 0 : index
    %c5 = arith.constant 5 : index
    %c0_14 = arith.constant 0 : index
    %44 = vector.load %arg3[%c0_13, %c5, %c0_14] : memref<2x8x32xf32, #tpu.memory_space<vmem>>, vector<2x1x32xf32>
    %45 = arith.maximumf %37, %44 : vector<2x1x32xf32>
    %46 = arith.minimumf %37, %44 : vector<2x1x32xf32>
    %47 = arith.maximumf %39, %46 : vector<2x1x32xf32>
    %48 = arith.minimumf %39, %46 : vector<2x1x32xf32>
    %49 = arith.maximumf %41, %48 : vector<2x1x32xf32>
    %50 = arith.minimumf %41, %48 : vector<2x1x32xf32>
    %51 = arith.maximumf %43, %50 : vector<2x1x32xf32>
    %c0_15 = arith.constant 0 : index
    %c6 = arith.constant 6 : index
    %c0_16 = arith.constant 0 : index
    %52 = vector.load %arg3[%c0_15, %c6, %c0_16] : memref<2x8x32xf32, #tpu.memory_space<vmem>>, vector<2x1x32xf32>
    %53 = arith.maximumf %45, %52 : vector<2x1x32xf32>
    %54 = arith.minimumf %45, %52 : vector<2x1x32xf32>
    %55 = arith.maximumf %47, %54 : vector<2x1x32xf32>
    %56 = arith.minimumf %47, %54 : vector<2x1x32xf32>
    %57 = arith.maximumf %49, %56 : vector<2x1x32xf32>
    %58 = arith.minimumf %49, %56 : vector<2x1x32xf32>
    %59 = arith.maximumf %51, %58 : vector<2x1x32xf32>
    %c0_17 = arith.constant 0 : index
    %c7 = arith.constant 7 : index
    %c0_18 = arith.constant 0 : index
    %60 = vector.load %arg3[%c0_17, %c7, %c0_18] : memref<2x8x32xf32, #tpu.memory_space<vmem>>, vector<2x1x32xf32>
    %61 = arith.maximumf %53, %60 : vector<2x1x32xf32>
    %62 = arith.minimumf %53, %60 : vector<2x1x32xf32>
    %63 = arith.maximumf %55, %62 : vector<2x1x32xf32>
    %64 = arith.minimumf %55, %62 : vector<2x1x32xf32>
    %65 = arith.maximumf %57, %64 : vector<2x1x32xf32>
    %66 = arith.minimumf %57, %64 : vector<2x1x32xf32>
    %67 = arith.maximumf %59, %66 : vector<2x1x32xf32>
    %cst_19 = arith.constant 0.000000e+00 : f32
    %68 = vector.broadcast %cst_19 : f32 to vector<2x1x32xf32>
    %69 = arith.addf %68, %61 : vector<2x1x32xf32>
    %70 = arith.addf %69, %63 : vector<2x1x32xf32>
    %71 = arith.addf %70, %65 : vector<2x1x32xf32>
    %72 = arith.addf %71, %67 : vector<2x1x32xf32>
    %cst_20 = arith.constant 2.500000e-01 : f32
    %73 = vector.broadcast %cst_20 : f32 to vector<2x1x32xf32>
    %74 = arith.mulf %72, %73 : vector<2x1x32xf32>
    %75 = vector.shape_cast %74 : vector<2x1x32xf32> to vector<2x32xf32>
    %c0_21 = arith.constant 0 : index
    %c0_22 = arith.constant 0 : index
    %76 = vector.load %arg4[%c0_21, %c0_22] : memref<2x32xf32, #tpu.memory_space<vmem>>, vector<2x32xf32>
    tpu.vector_store %arg4[%c0_21, %c0_22], %75 {strides = array<i32>} : memref<2x32xf32, #tpu.memory_space<vmem>>, vector<2x32xf32>,
    return
  }
  func.func @transform_0(%arg0: i32, %arg1: i32, %arg2: i32) -> (i32, i32, i32) {
    %c0_i32 = arith.constant 0 : i32
    return %arg0, %arg2, %arg1 : i32, i32, i32
  }
  func.func @transform_1(%arg0: i32, %arg1: i32, %arg2: i32) -> (i32, i32) {
    %c0_i32 = arith.constant 0 : i32
    return %arg0, %arg1 : i32, i32
  }
}

</mosaic_0001>

<bundles_post_ra>
// kernel: tpu_custom_call.1
= control target key start
LH: loop header
LB: loop body
LE: loop exit
PB: predicated region body
PF: predicated region fallthrough
CT: control target
= control target key end

     0   :  { %6 = vsyncpa [#allocation3], 0  ;;  %s256_s0 = inlined_call_operand.hbm [shape: f32[2,8,32], index: 0, kind: input, shape index: {}]   ;;  %s257_s1 = inlined_call_operand.hbm [shape: f32[2,32], index: 1, kind: output, shape index: {}]  }
   0x1   :  { %7 = vsyncpa [#allocation4], 0  ;;  %s12_s8 = sshll.u32 %s256_s0, 4  ;;  %s236_s9 = smov [#allocation2]   ;;  %s13_s8 = int_to_ptr.hbm [resolvable:$true] %s12_s8 }
   0x2   :  { %s14_s10 = sshll.u32 %s236_s9, 4  ;;  %s237_s11 = smov 128   ;;  %s15_s10 = int_to_ptr.vmem [resolvable:$true] %s14_s10 }
   0x3   :  { %s238_s12 = smov 8  }
   0x4   :  { %20 = dma.hbm_to_vmem [thread:$0]  %s13_s8, 256, %s15_s10, [#allocation3], %s237_s11, %s237_s11, %s238_s12  }
   0x5   :  { %232 = dma.done.wait [#allocation3], 256  }
   0x6   :  { %233 = vsyncadd [#allocation3], 4294967040  ;;  %v25_v0 = vld [vmem:[#allocation2] sm:$0x1]  ;;  %v26_v1 = vld [vmem:[#allocation2 + $0x8] sm:$0x1] }
   0x7   :  { %v33_v2 = vld [vmem:[#allocation2 + $0x1] sm:$0x1]  ;;  %v27_v3 = vmin.f32 %v25_v0, -inf  ;;  %v28_v4 = vmin.f32 %v26_v1, -inf  ;;  %v34_v5 = vld [vmem:[#allocation2 + $0x9] sm:$0x1] }
   0x8   :  { %v35_v6 = vmax.f32 %v25_v0, %v33_v2  ;;  %v37_v7 = vmin.f32 %v25_v0, %v33_v2  ;;  %v49_v8 = vld [vmem:[#allocation2 + $0x2] sm:$0x1]  ;;  %v36_v9 = vmax.f32 %v26_v1, %v34_v5  ;;  %v38_v10 = vmin.f32 %v26_v1, %v34_v5  ;;  %v50_v11 = vld [vmem:[#allocation2 + $0xa] sm:$0x1]  ;;  %v65_v20 = vld [vmem:[#allocation2 + $0x3] sm:$0x1] }
   0x9   :  { %v29_v12 = vmin.f32 %v27_v3, -inf  ;;  %v30_v13 = vmin.f32 %v28_v4, -inf  ;;  %v66_v21 = vld [vmem:[#allocation2 + $0xb] sm:$0x1]  ;;  %v81_v30 = vld [vmem:[#allocation2 + $0x4] sm:$0x1] }
   0xa   :  { %v39_v14 = vmax.f32 %v27_v3, %v37_v7  ;;  %v41_v15 = vmin.f32 %v27_v3, %v37_v7  ;;  %v40_v16 = vmax.f32 %v28_v4, %v38_v10  ;;  %v42_v17 = vmin.f32 %v28_v4, %v38_v10  ;;  %v82_v31 = vld [vmem:[#allocation2 + $0xc] sm:$0x1]  ;;  %v97_v52 = vld [vmem:[#allocation2 + $0x5] sm:$0x1]  ;;  %v98_v57 = vld [vmem:[#allocation2 + $0xd] sm:$0x1] }
   0xb   :  { %v51_v18 = vmax.f32 %v35_v6, %v49_v8  ;;  %v52_v19 = vmax.f32 %v36_v9, %v50_v11  ;;  %v31_v22 = vmin.f32 %v29_v12, -inf  ;;  %v32_v23 = vmin.f32 %v30_v13, -inf  ;;  %v113_v2 = vld [vmem:[#allocation2 + $0x6] sm:$0x1]  ;;  %v114_v3 = vld [vmem:[#allocation2 + $0xe] sm:$0x1] }
   0xc   :  { %v43_v24 = vmax.f32 %v29_v12, %v41_v15  ;;  %v45_v25 = vmin.f32 %v29_v12, %v41_v15  ;;  %v44_v26 = vmax.f32 %v30_v13, %v42_v17  ;;  %v46_v27 = vmin.f32 %v30_v13, %v42_v17  ;;  %s239_s0 = smov [#allocation5]   ;;  %s170_s16 = sshll.u32 %s257_s1, 4  ;;  %s171_s16 = int_to_ptr.hbm [resolvable:$true] %s170_s16 }
   0xd   :  { %v53_v28 = vmin.f32 %v35_v6, %v49_v8  ;;  %v54_v29 = vmin.f32 %v36_v9, %v50_v11  ;;  %v67_v33 = vmax.f32 %v51_v18, %v65_v20  ;;  %v68_v34 = vmax.f32 %v52_v19, %v66_v21  ;;  %s168_s13 = sshll.u32 %s239_s0, 4  ;;  %s169_s13 = int_to_ptr.vmem [resolvable:$true] %s168_s13 }
   0xe   :  { %v47_v32 = vmax.f32 %v31_v22, %v45_v25  ;;  %v69_v35 = vmin.f32 %v51_v18, %v65_v20  ;;  %v48_v36 = vmax.f32 %v32_v23, %v46_v27  ;;  %v70_v41 = vmin.f32 %v52_v19, %v66_v21  ;;  %v130_v27 = vld [vmem:[#allocation2 + $0xf] sm:$0x1] }
   0xf   :  { %v55_v37 = vmax.f32 %v39_v14, %v53_v28  ;;  %v56_v38 = vmax.f32 %v40_v16, %v54_v29  ;;  %v57_v39 = vmin.f32 %v39_v14, %v53_v28  ;;  %v58_v40 = vmin.f32 %v40_v16, %v54_v29 }
  0x10   :  { %v83_v42 = vmax.f32 %v67_v33, %v81_v30  ;;  %v84_v43 = vmax.f32 %v68_v34, %v82_v31  ;;  %v85_v56 = vmin.f32 %v67_v33, %v81_v30  ;;  %v86_v61 = vmin.f32 %v68_v34, %v82_v31 }
  0x11   :  { %v59_v44 = vmax.f32 %v43_v24, %v57_v39  ;;  %v61_v45 = vmin.f32 %v43_v24, %v57_v39  ;;  %v71_v46 = vmax.f32 %v55_v37, %v69_v35  ;;  %v73_v47 = vmin.f32 %v55_v37, %v69_v35  ;;  %v129_v24 = vld [vmem:[#allocation2 + $0x7] sm:$0x1] }
  0x12   :  { %v60_v48 = vmax.f32 %v44_v26, %v58_v40  ;;  %v62_v49 = vmin.f32 %v44_v26, %v58_v40  ;;  %v72_v50 = vmax.f32 %v56_v38, %v70_v41  ;;  %v74_v51 = vmin.f32 %v56_v38, %v70_v41 }
  0x13   :  { %v63_v53 = vmax.f32 %v47_v32, %v61_v45  ;;  %v75_v54 = vmax.f32 %v59_v44, %v73_v47  ;;  %v77_v55 = vmin.f32 %v59_v44, %v73_v47  ;;  %v87_v63 = vmax.f32 %v71_v46, %v85_v56 }
  0x14   :  { %v64_v58 = vmax.f32 %v48_v36, %v62_v49  ;;  %v76_v59 = vmax.f32 %v60_v48, %v74_v51  ;;  %v78_v60 = vmin.f32 %v60_v48, %v74_v51  ;;  %v89_v0 = vmin.f32 %v71_v46, %v85_v56 }
  0x15   :  { %v79_v62 = vmax.f32 %v63_v53, %v77_v55  ;;  %v99_v1 = vmax.f32 %v83_v42, %v97_v52  ;;  %v88_v5 = vmax.f32 %v72_v50, %v86_v61  ;;  %v90_v6 = vmin.f32 %v72_v50, %v86_v61 }
  0x16   :  { %v80_v4 = vmax.f32 %v64_v58, %v78_v60  ;;  %v100_v7 = vmax.f32 %v84_v43, %v98_v57  ;;  %v91_v8 = vmax.f32 %v75_v54, %v89_v0  ;;  %v93_v9 = vmin.f32 %v75_v54, %v89_v0 }
  0x17   :  { %v101_v10 = vmin.f32 %v83_v42, %v97_v52  ;;  %v102_v11 = vmin.f32 %v84_v43, %v98_v57  ;;  %v92_v12 = vmax.f32 %v76_v59, %v90_v6  ;;  %v94_v13 = vmin.f32 %v76_v59, %v90_v6 }
  0x18   :  { %v115_v14 = vmax.f32 %v99_v1, %v113_v2  ;;  %v116_v15 = vmax.f32 %v100_v7, %v114_v3  ;;  %v95_v16 = vmax.f32 %v79_v62, %v93_v9  ;;  %v117_v22 = vmin.f32 %v99_v1, %v113_v2 }
  0x19   :  { %v103_v17 = vmax.f32 %v87_v63, %v101_v10  ;;  %v104_v18 = vmax.f32 %v88_v5, %v102_v11  ;;  %v105_v19 = vmin.f32 %v87_v63, %v101_v10  ;;  %v96_v20 = vmax.f32 %v80_v4, %v94_v13 }
  0x1a   :  { %v106_v21 = vmin.f32 %v88_v5, %v102_v11  ;;  %v118_v23 = vmin.f32 %v100_v7, %v114_v3  ;;  %v133_v35 = vmin.f32 %v115_v14, %v129_v24  ;;  %v131_v37 = vmax.f32 %v115_v14, %v129_v24 }
  0x1b   :  { %v107_v25 = vmax.f32 %v91_v8, %v105_v19  ;;  %v109_v26 = vmin.f32 %v91_v8, %v105_v19  ;;  %v119_v30 = vmax.f32 %v103_v17, %v117_v22  ;;  %v121_v33 = vmin.f32 %v103_v17, %v117_v22 }
  0x1c   :  { %v108_v28 = vmax.f32 %v92_v12, %v106_v21  ;;  %v110_v29 = vmin.f32 %v92_v12, %v106_v21  ;;  %v120_v31 = vmax.f32 %v104_v18, %v118_v23  ;;  %v122_v34 = vmin.f32 %v104_v18, %v118_v23 }
  0x1d   :  { %v111_v32 = vmax.f32 %v95_v16, %v109_v26  ;;  %v132_v38 = vmax.f32 %v116_v15, %v130_v27  ;;  %v134_v39 = vmin.f32 %v116_v15, %v130_v27  ;;  %v123_v40 = vmax.f32 %v107_v25, %v121_v33 }
  0x1e   :  { %v112_v36 = vmax.f32 %v96_v20, %v110_v29  ;;  %v124_v41 = vmax.f32 %v108_v28, %v122_v34  ;;  %v125_v42 = vmin.f32 %v107_v25, %v121_v33  ;;  %v126_v43 = vmin.f32 %v108_v28, %v122_v34 }
  0x1f   :  { %v135_v44 = vmax.f32 %v119_v30, %v133_v35  ;;  %v136_v45 = vmax.f32 %v120_v31, %v134_v39  ;;  %v137_v46 = vmin.f32 %v119_v30, %v133_v35  ;;  %v138_v47 = vmin.f32 %v120_v31, %v134_v39 }
  0x20   :  { %v127_v48 = vmax.f32 %v111_v32, %v125_v42  ;;  %v128_v49 = vmax.f32 %v112_v36, %v126_v43  ;;  %vm158_vm0 = vcmask 1041409   ;;  %vm161_vm1 = vcmask 254976  }
  0x21   :  { %v139_v50 = vmax.f32 %v123_v40, %v137_v46  ;;  %v140_v51 = vmax.f32 %v124_v41, %v138_v47  ;;  %v141_v52 = vmin.f32 %v123_v40, %v137_v46  ;;  %v142_v53 = vmin.f32 %v124_v41, %v138_v47 }
  0x22   :  { %v147_v54 = vadd.f32 %v135_v44, %v131_v37  ;;  %v148_v55 = vadd.f32 %v136_v45, %v132_v38 }
  0x23   :  { %v143_v56 = vmax.f32 %v127_v48, %v141_v52  ;;  %v144_v57 = vmax.f32 %v128_v49, %v142_v53 }
  0x24   :  { %v149_v58 = vadd.f32 %v147_v54, %v139_v50  ;;  %v150_v59 = vadd.f32 %v148_v55, %v140_v51 }
  0x26   :  { %v151_v60 = vadd.f32 %v149_v58, %v143_v56  ;;  %v152_v61 = vadd.f32 %v150_v59, %v144_v57 }
  0x28   :  { %v153_v62 = vmul.f32 0.25, %v151_v60  ;;  %v154_v63 = vmul.f32 0.25, %v152_v61 }
  0x2a   :  { %v157_v0 = vrot.slane %v154_v63, 7 }
  0x2c   :  { %v159_v1 = vsel %vm158_vm0, %v157_v0, %v153_v62 }
  0x2d   :  { %162 = vst.msk [vmem:[#allocation5] sm:$0x3] %vm161_vm1, %v159_v1 }
  0x2e   :  { %173 = dma.vmem_to_hbm [thread:$0]  %s169_s13, 32, %s171_s16, [#allocation4]  }
  0x2f   :  { %234 = dma.done.wait [#allocation4], 32  }
  0x30   :  { %235 = vsyncadd [#allocation4], 4294967264 }
  0x31   :  { %178 = vsyncpa [#allocation3], 1 }
  0x32   :  { %179 = vsyncpa [#allocation4], 1 }

</bundles_post_ra>
